<compile_context>
chip_gen: v7x
topology: tpu7x:2x2x1
jax: 0.10.0
libtpu: 0.0.40
codegen_flags: <defaults>
</compile_context>

<pallas_src>
import jax
import jax.numpy as jnp
from jax.experimental import pallas as pl
from jax.experimental.pallas import tpu as pltpu

_LANE = 128
_DEFAULT_TM = 512
_DEFAULT_TN = 512
_DEFAULT_TK = 1024


def _round_up(x: int, m: int) -> int:
    return (x + m - 1) // m * m


def _fit_dim(d: int, t: int, align: int):
    """Pick a tile (<= t, align-rounded) and the padded extent it divides."""
    t = min(t, _round_up(d, align))
    return _round_up(d, t), t


def _vmem_budget_bytes() -> int:
    """Generation-aware VMEM budget: ~75% of physical VMEM (96 MiB on the
    128-MiB generations v5e/v6e, 48 MiB on v7x); conservative fallback."""
    try:
        info = pltpu.get_tpu_info()
        cap = getattr(info, "vmem_capacity_bytes", None)
        if cap:
            return (int(cap) * 3) // 4
    except Exception:
        pass
    return 48 * 1024 * 1024


def _make_kernel(activation, *, weight_resident: bool, tk: int, use_scratch: bool):
    """Kernel body. K is grid axis 2 (innermost / serial) in both schedules."""

    def kernel(x_ref, wt_ref, o_ref, *scratch):
        acc_ref = scratch[0] if use_scratch else o_ref
        k = pl.program_id(2)

        @pl.when(k == 0)
        def _init():
            acc_ref[...] = jnp.zeros_like(acc_ref)

        if weight_resident:
            # Weight block is the full-(Kp, tn) panel, resident in VMEM across
            # the M and K grid axes; slice out this K-step's (tk, tn) tile.
            off = pl.multiple_of(k * tk, _LANE)
            w_tile = wt_ref[pl.ds(off, tk), :]
        else:
            w_tile = wt_ref[...]

        acc_ref[...] += jnp.dot(x_ref[...], w_tile,
                                preferred_element_type=jnp.float32)

        @pl.when(k == pl.num_programs(2) - 1)
        def _finalize():
            # Activation fused before the VMEM->HBM writeback.
            o_ref[...] = activation(acc_ref[...]).astype(o_ref.dtype)

    return kernel


def prepare_weight(weight: jax.Array, *, dtype=jnp.float32,
                   tn: int = _DEFAULT_TN, tk: int = _DEFAULT_TK) -> jax.Array:
    """One-time conversion from PyTorch nn.Linear layout [out, in] to the
    kernel layout [in, out]: transpose, cast to the MXU operand dtype (bf16
    halves the weight DMA bytes per grid step) and pad K/N to the tile grid so
    the forward path never touches O(K*N) padding traffic per call."""
    tn = max(_LANE, (tn // _LANE) * _LANE)
    tk = max(_LANE, (tk // _LANE) * _LANE)
    wt = jnp.asarray(weight).T.astype(dtype)
    K, N = wt.shape
    Kp, _ = _fit_dim(K, tk, _LANE)
    Np, _ = _fit_dim(N, tn, _LANE)
    if (Kp, Np) != (K, N):
        wt = jnp.pad(wt, ((0, Kp - K), (0, Np - N)))
    return wt


def linear_nn_forward(
    x: jax.Array,
    wt: jax.Array,
    *,
    out_dims: int | None = None,
    activation=jnp.tanh,
    out_dtype=jnp.float32,
    tm: int = _DEFAULT_TM,
    tn: int = _DEFAULT_TN,
    tk: int = _DEFAULT_TK,
    weight_resident: bool | None = None,
) -> jax.Array:
    """Equivalent of LinearNN.forward with F = `activation` (default tanh).

    x:  [M, K]  (batch, inpt_dims)
    wt: [Kp, Np] pre-transposed (and possibly pre-padded) weight, see
        prepare_weight(); x is cast to wt.dtype in the wrapper.
    returns [M, out_dims] in out_dtype.
    """
    M, K = x.shape
    K_w, N_w = wt.shape
    if K_w < K:
        raise ValueError("weight in-features smaller than x features")
    if out_dims is None:
        out_dims = N_w

    # Cast x upstream of the kernel so the DMA moves the narrow operand bytes.
    if x.dtype != wt.dtype:
        x = x.astype(wt.dtype)

    op_bytes = wt.dtype.itemsize
    out_bytes = jnp.dtype(out_dtype).itemsize
    # bf16 (any 2-byte operand/output) packs 2 rows per sublane -> 16-row tiles.
    row_mult = 8 if (op_bytes >= 4 and out_bytes >= 4) else 16

    # Sanitize / clamp tiles (lane-dense N, MXU-aligned K, sublane-aligned M).
    tn = max(_LANE, (tn // _LANE) * _LANE)
    tk = max(_LANE, (tk // _LANE) * _LANE)
    tm = max(row_mult, (tm // row_mult) * row_mult)
    tm = min(tm, _round_up(M, row_mult))
    Np, tn = _fit_dim(N_w, tn, _LANE)
    Kp, tk = _fit_dim(K_w, tk, _LANE)

    # Keep both v7x TensorCores busy for skinny-batch shapes (>= 2 blocks along
    # a "parallel" grid axis). Halving preserves divisibility of padded dims.
    if _round_up(M, tm) // tm == 1 and Np // tn == 1:
        if tn >= 2 * _LANE:
            tn //= 2
        elif tm >= 2 * row_mult:
            tm //= 2

    budget = _vmem_budget_bytes()

    def vmem_est(tm_, tn_, tk_, resident):
        w_rows = Kp if resident else tk_
        est = 2 * tm_ * tk_ * op_bytes          # x double buffer
        est += 2 * w_rows * tn_ * op_bytes      # weight double buffer / panel
        est += 2 * tm_ * tn_ * out_bytes        # output double buffer
        if jnp.dtype(out_dtype) != jnp.dtype(jnp.float32):
            est += tm_ * tn_ * 4                # f32 accumulator scratch
        return est

    # Weight-resident schedule: worth it on big-VMEM generations (v5e/v6e) when
    # the weight would otherwise be re-streamed once per M-tile. Never auto-
    # enabled when the VMEM budget is small (v7x / unknown).
    if weight_resident is None:
        weight_resident = (
            budget >= 80 * 1024 * 1024
            and _round_up(M, tm) // tm >= 2
            and vmem_est(tm, tn, tk, True) <= budget // 2
        )
    if weight_resident and vmem_est(tm, tn, tk, True) > budget:
        weight_resident = False  # safety valve (e.g. forced on v7x with huge K)

    # Shrink tiles if needed; halving keeps divisibility of the padded dims.
    while vmem_est(tm, tn, tk, weight_resident) > budget:
        if (not weight_resident) and tk >= 2 * _LANE:
            tk //= 2
        elif tn >= 2 * _LANE:
            tn //= 2
        elif tm >= 2 * row_mult:
            tm //= 2
        else:
            break

    Mp = _round_up(M, tm)

    # Pad ragged dims. x is padded per call (cheap, O(M*K)); the weight pad is
    # a fallback only — prepare_weight() already produced an aligned layout.
    if (Mp, Kp) != (M, K):
        x = jnp.pad(x, ((0, Mp - M), (0, Kp - K)))
    if (Kp, Np) != (K_w, N_w):
        wt = jnp.pad(wt, ((0, Kp - K_w), (0, Np - N_w)))

    gm, gn, gk = Mp // tm, Np // tn, Kp // tk
    use_scratch = jnp.dtype(out_dtype) != jnp.dtype(jnp.float32)

    if weight_resident:
        # Grid (n, m, k): the (Kp, tn) weight panel's index ignores m and k, so
        # each panel is DMA'd from HBM exactly once (not once per M-tile).
        grid = (gn, gm, gk)
        x_spec = pl.BlockSpec((tm, tk), lambda j, i, k: (i, k))
        w_spec = pl.BlockSpec((Kp, tn), lambda j, i, k: (0, j))
        o_spec = pl.BlockSpec((tm, tn), lambda j, i, k: (i, j))
        wt_reads = 1
    else:
        # Streamed schedule (right for v7x's 64 MiB VMEM / 3.2 TB/s HBM).
        grid = (gm, gn, gk)
        x_spec = pl.BlockSpec((tm, tk), lambda i, j, k: (i, k))
        w_spec = pl.BlockSpec((tk, tn), lambda i, j, k: (k, j))
        o_spec = pl.BlockSpec((tm, tn), lambda i, j, k: (i, j))
        wt_reads = gm

    kernel = _make_kernel(activation, weight_resident=weight_resident,
                          tk=tk, use_scratch=use_scratch)

    # Actual HBM traffic including re-streaming factors (x read gn times, the
    # weight read gm times when streamed / once when resident).
    bytes_accessed = (Mp * Kp * op_bytes * gn
                      + Kp * Np * op_bytes * wt_reads
                      + Mp * Np * out_bytes)

    out = pl.pallas_call(
        kernel,
        out_shape=jax.ShapeDtypeStruct((Mp, Np), out_dtype),
        grid_spec=pltpu.PrefetchScalarGridSpec(
            num_scalar_prefetch=0,
            grid=grid,
            in_specs=[x_spec, w_spec],
            out_specs=o_spec,
            scratch_shapes=([pltpu.VMEM((tm, tn), jnp.float32)]
                            if use_scratch else []),
        ),
        compiler_params=pltpu.CompilerParams(
            dimension_semantics=("parallel", "parallel", "arbitrary"),
            vmem_limit_bytes=budget,
        ),
        cost_estimate=pl.CostEstimate(
            flops=2 * Mp * Np * Kp,
            transcendentals=Mp * Np,
            bytes_accessed=bytes_accessed,
        ),
    )(x, wt)

    if (Mp, Np) != (M, out_dims):
        out = out[:M, :out_dims]
    return out


if __name__ == "__main__":
    key = jax.random.PRNGKey(0)
    kx, kw, kx2, kx3, kw3 = jax.random.split(key, 5)

    # Small shapes consistent with the module: batch=8, inpt_dims=32, out_dims=64.
    batch, inpt_dims, out_dims = 8, 32, 64
    x = jax.random.normal(kx, (batch, inpt_dims), dtype=jnp.float32)
    # Deterministic init mimicking nn.Linear's uniform(-1/sqrt(in), 1/sqrt(in)).
    bound = 1.0 / jnp.sqrt(jnp.float32(inpt_dims))
    weight = jax.random.uniform(
        kw, (out_dims, inpt_dims), dtype=jnp.float32, minval=-bound, maxval=bound
    )
    ref = jnp.tanh(jnp.dot(x, weight.T, precision=jax.lax.Precision.HIGHEST))

    # f32 operands, f32 output (direct-into-output accumulation path).
    wt_f32 = prepare_weight(weight, dtype=jnp.float32)
    out = linear_nn_forward(x, wt_f32, out_dims=out_dims)
    jax.block_until_ready(out)
    assert out.shape == (batch, out_dims)
    assert jnp.allclose(out, ref, atol=1e-5, rtol=1e-5)

    # Ragged batch exercises the M-padding path.
    x2 = jax.random.normal(kx2, (13, inpt_dims), dtype=jnp.float32)
    out2 = linear_nn_forward(x2, wt_f32, out_dims=out_dims)
    jax.block_until_ready(out2)
    ref2 = jnp.tanh(jnp.dot(x2, weight.T, precision=jax.lax.Precision.HIGHEST))
    assert out2.shape == (13, out_dims)
    assert jnp.allclose(out2, ref2, atol=1e-5, rtol=1e-5)

    # bf16 operands stored bf16 in HBM (halves DMA bytes); bf16 output
    # exercises the f32-scratch accumulator path and 16-row bf16 tiling.
    wt_bf16 = prepare_weight(weight, dtype=jnp.bfloat16)
    out3 = linear_nn_forward(x, wt_bf16, out_dims=out_dims, out_dtype=jnp.bfloat16)
    jax.block_until_ready(out3)
    assert out3.shape == (batch, out_dims) and out3.dtype == jnp.bfloat16
    assert jnp.allclose(out3.astype(jnp.float32), ref, atol=3e-2, rtol=3e-2)

    # Medium shape with multiple M/K tiles: exercise both the weight-resident
    # (v5e/v6e) schedule and the default streamed (v7x) schedule.
    M2, K2, N2 = 1024, 2048, 256
    xb = jax.random.normal(kx3, (M2, K2), dtype=jnp.float32)
    bound2 = 1.0 / jnp.sqrt(jnp.float32(K2))
    wb = jax.random.uniform(kw3, (N2, K2), dtype=jnp.float32,
                            minval=-bound2, maxval=bound2)
    wtb = prepare_weight(wb, dtype=jnp.float32)
    ref4 = jnp.tanh(jnp.dot(xb, wb.T, precision=jax.lax.Precision.HIGHEST))

    out4 = linear_nn_forward(xb, wtb, out_dims=N2, weight_resident=True)
    jax.block_until_ready(out4)
    assert out4.shape == (M2, N2)
    assert jnp.allclose(out4, ref4, atol=1e-3, rtol=1e-3)

    out5 = linear_nn_forward(xb, wtb, out_dims=N2, weight_resident=False)
    jax.block_until_ready(out5)
    assert jnp.allclose(out5, ref4, atol=1e-3, rtol=1e-3)

    # TODO(synk): F is an arbitrary Python callable in the PyTorch module; here
    # it must be a JAX-traceable elementwise function (tanh demonstrated).
    print("KERNEL_OK")
</pallas_src>

<mosaic_0001>
module attributes {stable_mosaic.version = 11 : i64} {
  func.func @kernel(%arg0: i32, %arg1: i32, %arg2: i32, %arg3: memref<8x128xf32, #tpu.memory_space<vmem>>, %arg4: memref<128x128xf32, #tpu.memory_space<vmem>>, %arg5: memref<8x128xf32, #tpu.memory_space<vmem>>) attributes {dimension_semantics = [#tpu.dimension_semantics<parallel>, #tpu.dimension_semantics<parallel>, #tpu.dimension_semantics<arbitrary>], iteration_bounds = array<i64: 1, 1, 1>, scalar_prefetch = 0 : i64, scratch_operands = 0 : i64, tpu.core_type = #tpu.core_type<tc>, window_params = [{transform_indices = @transform_0, window_bounds = array<i64: 8, 128>}, {transform_indices = @transform_1, window_bounds = array<i64: 128, 128>}, {transform_indices = @transform_2, window_bounds = array<i64: 8, 128>}]} {
    %c0_i32 = arith.constant 0 : i32
    %0 = arith.cmpi eq, %arg2, %c0_i32 : i32
    %1 = arith.extui %0 : i1 to i32
    %c0_i32_0 = arith.constant 0 : i32
    %2 = arith.cmpi ne, %1, %c0_i32_0 : i32
    scf.if %2 {
      %cst_10 = arith.constant 0.000000e+00 : f32
      %12 = vector.broadcast %cst_10 : f32 to vector<8x128xf32>
      %c0_11 = arith.constant 0 : index
      %c0_12 = arith.constant 0 : index
      %13 = vector.load %arg5[%c0_11, %c0_12] : memref<8x128xf32, #tpu.memory_space<vmem>>, vector<8x128xf32>
      tpu.vector_store %arg5[%c0_11, %c0_12], %12 {strides = array<i32>} : memref<8x128xf32, #tpu.memory_space<vmem>>, vector<8x128xf32>,
    } else {
    }
    %c0 = arith.constant 0 : index
    %c0_1 = arith.constant 0 : index
    %3 = vector.load %arg4[%c0, %c0_1] : memref<128x128xf32, #tpu.memory_space<vmem>>, vector<128x128xf32>
    %c0_2 = arith.constant 0 : index
    %c0_3 = arith.constant 0 : index
    %4 = vector.load %arg5[%c0_2, %c0_3] : memref<8x128xf32, #tpu.memory_space<vmem>>, vector<8x128xf32>
    %c0_4 = arith.constant 0 : index
    %c0_5 = arith.constant 0 : index
    %5 = vector.load %arg3[%c0_4, %c0_5] : memref<8x128xf32, #tpu.memory_space<vmem>>, vector<8x128xf32>
    %cst = arith.constant dense<0.000000e+00> : vector<8x128xf32>
    %6 = tpu.matmul %5, %3, %cst {dimension_numbers = #tpu.dot_dimension_numbers<[1], [0], [0], [1], [0, 0, 1, 1], [], []>} : vector<8x128xf32>, vector<128x128xf32>, vector<8x128xf32> -> vector<8x128xf32>
    %7 = arith.addf %4, %6 : vector<8x128xf32>
    %c0_6 = arith.constant 0 : index
    %c0_7 = arith.constant 0 : index
    %8 = vector.load %arg5[%c0_6, %c0_7] : memref<8x128xf32, #tpu.memory_space<vmem>>, vector<8x128xf32>
    tpu.vector_store %arg5[%c0_6, %c0_7], %7 {strides = array<i32>} : memref<8x128xf32, #tpu.memory_space<vmem>>, vector<8x128xf32>,
    %c0_i32_8 = arith.constant 0 : i32
    %9 = arith.cmpi eq, %arg2, %c0_i32_8 : i32
    %10 = arith.extui %9 : i1 to i32
    %c0_i32_9 = arith.constant 0 : i32
    %11 = arith.cmpi ne, %10, %c0_i32_9 : i32
    scf.if %11 {
      %c0_10 = arith.constant 0 : index
      %c0_11 = arith.constant 0 : index
      %12 = vector.load %arg5[%c0_10, %c0_11] : memref<8x128xf32, #tpu.memory_space<vmem>>, vector<8x128xf32>
      %13 = math.tanh %12 : vector<8x128xf32>
      %c0_12 = arith.constant 0 : index
      %c0_13 = arith.constant 0 : index
      %14 = vector.load %arg5[%c0_12, %c0_13] : memref<8x128xf32, #tpu.memory_space<vmem>>, vector<8x128xf32>
      tpu.vector_store %arg5[%c0_12, %c0_13], %13 {strides = array<i32>} : memref<8x128xf32, #tpu.memory_space<vmem>>, vector<8x128xf32>,
    } else {
    }
    return
  }
  func.func @transform_0(%arg0: i32, %arg1: i32, %arg2: i32) -> (i32, i32) {
    %c0_i32 = arith.constant 0 : i32
    return %arg0, %arg2 : i32, i32
  }
  func.func @transform_1(%arg0: i32, %arg1: i32, %arg2: i32) -> (i32, i32) {
    %c0_i32 = arith.constant 0 : i32
    return %arg2, %arg1 : i32, i32
  }
  func.func @transform_2(%arg0: i32, %arg1: i32, %arg2: i32) -> (i32, i32) {
    %c0_i32 = arith.constant 0 : i32
    return %arg0, %arg1 : i32, i32
  }
}

</mosaic_0001>

<bundles_post_ra>
// kernel: tpu_custom_call.1
= control target key start
LH: loop header
LB: loop body
LE: loop exit
PB: predicated region body
PF: predicated region fallthrough
CT: control target
= control target key end

     0   :  { %7 = vsyncpa [#allocation3], 0  ;;  %s379_s0 = inlined_call_operand.hbm [shape: f32[8,128], index: 0, kind: input, shape index: {}]   ;;  %s380_s1 = inlined_call_operand.hbm [shape: f32[128,128], index: 1, kind: input, shape index: {}]   ;;  %s381_s2 = inlined_call_operand.hbm [shape: f32[8,128], index: 2, kind: output, shape index: {}]  }
   0x1   :  { %8 = vsyncpa [#allocation6], 0 }
   0x2   :  { %9 = vsyncpa [#allocation4], 0  ;;  %s313_s9 = smov [#allocation2]   ;;  %s314_s11 = smov [#allocation5]  }
   0x3   :  { %s16_s10 = sshll.u32 %s313_s9, 4  ;;  %s25_s12 = sshll.u32 %s314_s11, 4  ;;  %s17_s10 = int_to_ptr.vmem [resolvable:$true] %s16_s10  ;;  %s336_s12 = int_to_ptr.vmem [resolvable:$true] %s25_s12 }
   0x4   :  { %s241_s15 = scalar_lea.hbm %s379_s0, 128 }
   0x5   :  { %p242_p0 = scmp.ne.s32.totalorder %s379_s0, %s241_s15  ;;  %p245_p1 = scmp.lt.u32.totalorder %s241_s15, %s379_s0 }
   0x7   :  { %p247_p2 = pnand %p245_p1, %p242_p0 }
   0x9   :  { %250 = shalt.err (!%p247_p2)
}
   0xa   :  { %s251_s20 = scalar_lea.vmem %s17_s10, 128  ;;  %p256_p4 = scmp.lt.s32.totalorder %s17_s10, %s17_s10 }
   0xb   :  { %p252_p3 = scmp.ne.s32.totalorder %s17_s10, %s251_s20  ;;  %p257_p5 = scmp.lt.s32.totalorder %s251_s20, %s251_s20 }
   0xd   :  { %p258_p6 = por %p257_p5, %p256_p4 }
   0xf   :  { %p259_p7 = pnand %p258_p6, %p252_p3 }
  0x11   :  { %262 = shalt.err (!%p259_p7)
}
  0x12   :  { %19 = dma.hbm_to_vmem [thread:$0]  %s379_s0, 128, %s17_s10, [#allocation3]  }
  0x13   :  { %s263_s25 = scalar_lea.hbm %s380_s1, 2048 }
  0x14   :  { %p264_p8 = scmp.ne.s32.totalorder %s380_s1, %s263_s25  ;;  %p267_p9 = scmp.lt.u32.totalorder %s263_s25, %s380_s1 }
  0x16   :  { %p269_p10 = pnand %p267_p9, %p264_p8 }
  0x18   :  { %272 = shalt.err (!%p269_p10)
}
  0x19   :  { %s273_s30 = scalar_lea.vmem %s336_s12, 2048  ;;  %p278_p12 = scmp.lt.s32.totalorder %s336_s12, %s336_s12 }
  0x1a   :  { %p274_p11 = scmp.ne.s32.totalorder %s336_s12, %s273_s30  ;;  %p279_p13 = scmp.lt.s32.totalorder %s273_s30, %s273_s30 }
  0x1c   :  { %p280_p0 = por %p279_p13, %p278_p12 }
  0x1e   :  { %p281_p1 = pnand %p280_p0, %p274_p11 }
  0x20   :  { %284 = shalt.err (!%p281_p1)
}
  0x21   :  { %s315_s0 = smov 128   ;;  %s316_s3 = smov 8  }
  0x22   :  { %31 = dma.hbm_to_vmem [thread:$0]  %s380_s1, 2048, %s336_s12, [#allocation6], %s315_s0, %s315_s0, %s316_s3  }
  0x23   :  { %307 = dma.done.wait [#allocation3], 128  }
  0x24   :  { %308 = vsyncadd [#allocation3], 4294967168 }
  0x25   :  { %309 = dma.done.wait [#allocation6], 2048  }
  0x26   :  { %310 = vsyncadd [#allocation6], 4294965248  ;;  %v317_v0 = vmov 0.0|0.0   ;;  %vm318_vm0 = vmmov 0   ;;  %v319_v1 = vmov 0.0   ;;  %v43_v2 = vld [vmem:[#allocation5] sm:$0xff] }
  0x27   :  { %207 = vmatprep.subr.bf16.mxu0 %v317_v0  ;;  %204 = vmatprep.mubr.msk.f32.mxu0 %vm318_vm0, %v319_v1  ;;  %v44_v3 = vld [vmem:[#allocation5 + $0x8] sm:$0xff]  ;;  %v45_v4 = vld [vmem:[#allocation5 + $0x10] sm:$0xff]  ;;  %v46_v6 = vld [vmem:[#allocation5 + $0x18] sm:$0xff]  ;;  %s320_s1 = smov [#allocation7]  }
  0x28   :  { %v208_v5 = vpack.c.bf16 %v44_v3, %v43_v2  ;;  %v211_v7 = vpack.c.bf16 %v46_v6, %v45_v4  ;;  %v47_v8 = vld [vmem:[#allocation5 + $0x20] sm:$0xff]  ;;  %v48_v9 = vld [vmem:[#allocation5 + $0x28] sm:$0xff]  ;;  %v49_v11 = vld [vmem:[#allocation5 + $0x30] sm:$0xff]  ;;  %s145_s6 = sshll.u32 %s320_s1, 4  ;;  %s146_s6 = int_to_ptr.vmem [resolvable:$true] %s145_s6 }
  0x29   :  { %v214_v10 = vpack.c.bf16 %v48_v9, %v47_v8  ;;  %v50_v12 = vld [vmem:[#allocation5 + $0x38] sm:$0xff]  ;;  %v51_v14 = vld [vmem:[#allocation5 + $0x40] sm:$0xff]  ;;  %v52_v15 = vld [vmem:[#allocation5 + $0x48] sm:$0xff]  ;;  %s285_s7 = scalar_lea.vmem %s146_s6, 128  ;;  %p290_p3 = scmp.lt.s32.totalorder %s146_s6, %s146_s6 }
  0x2a   :  { %209 = vmatpush3.bf16.msra.mxu0 %v208_v5  ;;  %v217_v13 = vpack.c.bf16 %v50_v12, %v49_v11  ;;  %v220_v16 = vpack.c.bf16 %v52_v15, %v51_v14  ;;  %v53_v17 = vld [vmem:[#allocation5 + $0x50] sm:$0xff]  ;;  %v54_v18 = vld [vmem:[#allocation5 + $0x58] sm:$0xff]  ;;  %v55_v20 = vld [vmem:[#allocation5 + $0x60] sm:$0xff]  ;;  %p286_p2 = scmp.ne.s32.totalorder %s146_s6, %s285_s7  ;;  %p291_p4 = scmp.lt.s32.totalorder %s285_s7, %s285_s7 }
  0x2b   :  { %210 = vmatprep.subr.bf16.mxu0 %v317_v0  ;;  %v223_v19 = vpack.c.bf16 %v54_v18, %v53_v17  ;;  %v56_v21 = vld [vmem:[#allocation5 + $0x68] sm:$0xff]  ;;  %v57_v23 = vld [vmem:[#allocation5 + $0x70] sm:$0xff]  ;;  %v58_v24 = vld [vmem:[#allocation5 + $0x78] sm:$0xff] }
  0x2c   :  { %v226_v22 = vpack.c.bf16 %v56_v21, %v55_v20  ;;  %v229_v25 = vpack.c.bf16 %v58_v24, %v57_v23  ;;  %v60_v26 = vld [vmem:[#allocation2] sm:$0xff]  ;;  %p292_p5 = por %p291_p4, %p290_p3 }
  0x2e   :  { %212 = vmatpush3.bf16.msra.mxu0 %v211_v7  ;;  %p293_p6 = pnand %p292_p5, %p286_p2 }
  0x2f   :  { %213 = vmatprep.subr.bf16.mxu0 %v317_v0 }
  0x32   :  { %215 = vmatpush3.bf16.msra.mxu0 %v214_v10 }
  0x33   :  { %216 = vmatprep.subr.bf16.mxu0 %v317_v0 }
  0x36   :  { %218 = vmatpush3.bf16.msra.mxu0 %v217_v13 }
  0x37   :  { %219 = vmatprep.subr.bf16.mxu0 %v317_v0 }
  0x3a   :  { %221 = vmatpush3.bf16.msra.mxu0 %v220_v16 }
  0x3b   :  { %222 = vmatprep.subr.bf16.mxu0 %v317_v0 }
  0x3e   :  { %224 = vmatpush3.bf16.msra.mxu0 %v223_v19 }
  0x3f   :  { %225 = vmatprep.subr.bf16.mxu0 %v317_v0 }
  0x42   :  { %227 = vmatpush3.bf16.msra.mxu0 %v226_v22 }
  0x43   :  { %228 = vmatprep.subr.bf16.mxu0 %v317_v0 }
  0x46   :  { %230 = vmatpush3.bf16.msra.mxu0 %v229_v25 }
  0x49   :  { %205 = vmatmul.mubr.f32.vlgmr.msra.gmra.mrb[0].mxu0 %v60_v26 }
 0x11c   :  { %v127_v27 = vpop.f32.mrb[0].mxu0 }
 0x11d   :  { %v206_v28 = vpop.f32.mrb[1].mxu0  ;;  %239 = vtanh.f32 %v127_v27 }
 0x127   :  { %v240_v29 = vpop.eup %239 }
 0x128   :  { %138 = vst [vmem:[#allocation7] sm:$0xff] %v240_v29 }
 0x129   :  { %296 = shalt.err (!%p293_p6)
}
 0x12a   :  { %s297_s10 = scalar_lea.hbm %s381_s2, 128 }
 0x12b   :  { %p298_p7 = scmp.ne.s32.totalorder %s381_s2, %s297_s10  ;;  %p301_p8 = scmp.lt.u32.totalorder %s297_s10, %s381_s2 }
 0x12d   :  { %p303_p9 = pnand %p301_p8, %p298_p7 }
 0x12f   :  { %306 = shalt.err (!%p303_p9)
}
 0x130   :  { %148 = dma.vmem_to_hbm [thread:$0]  %s146_s6, 128, %s381_s2, [#allocation4]  }
 0x131   :  { %311 = dma.done.wait [#allocation4], 128  }
 0x132   :  { %312 = vsyncadd [#allocation4], 4294967168 }
 0x133   :  { %152 = vsyncpa [#allocation3], 1 }
 0x134   :  { %153 = vsyncpa [#allocation6], 1 }
 0x135   :  { %154 = vsyncpa [#allocation4], 1 }

</bundles_post_ra>
